<compile_context>
chip_gen: v7x
topology: tpu7x:2x2x1
jax: 0.10.0
libtpu: 0.0.40
codegen_flags: <defaults>
</compile_context>

<pallas_src>
import functools

import jax
import jax.numpy as jnp
from jax import lax
from jax.experimental import pallas as pl
from jax.experimental.pallas import tpu as pltpu

# ---- model config (synthetic, small) ----
BATCH = 2
SEQ = 8
HIDDEN = 32
NUM_HEADS = 4
HEAD_DIM = HIDDEN // NUM_HEADS
ATTN_DROPOUT = 0.0  # inference / p=0 -> dropout is identity


# ---------------- Fused forward kernel ----------------
def _siglip_attn_kernel(*refs, has_mask, out_weights):
    """One grid step = (batch b, head h).

    x(L,E) @ Wq_h/Wk_h/Wv_h(E,D) -> softmax(q k^T + mask) -> ctx(L,D) @ Wo_h(D,E)
    accumulated into a resident f32 (L,E) scratch; bias added + written back on last head.
    """
    n_in = 10 if has_mask else 9
    (x_ref, wq_ref, bq_ref, wk_ref, bk_ref, wv_ref, bv_ref, wo_ref, bo_ref) = refs[:9]
    mask_ref = refs[9] if has_mask else None
    out_ref = refs[n_in]
    w_ref = refs[n_in + 1] if out_weights else None
    acc_ref = refs[-1]

    h = pl.program_id(1)

    @pl.when(h == 0)
    def _init():
        acc_ref[...] = jnp.zeros_like(acc_ref)

    cdt = wq_ref.dtype                 # MXU input dtype (bf16 in production, f32 in tests)
    x = x_ref[0]                       # (L, E), already in compute dtype (no f32 upcast)

    # Per-head projections (1/sqrt(D) already folded into Wq / bq), f32 accumulation.
    q = jnp.dot(x, wq_ref[0], preferred_element_type=jnp.float32) + bq_ref[0]   # (L, D)
    k = jnp.dot(x, wk_ref[0], preferred_element_type=jnp.float32) + bk_ref[0]   # (L, D)
    v = jnp.dot(x, wv_ref[0], preferred_element_type=jnp.float32) + bv_ref[0]   # (L, D)

    # q @ k^T via NT dot_general (no transpose materialized), f32 scores.
    s = lax.dot_general(q.astype(cdt), k.astype(cdt), (((1,), (1,)), ((), ())),
                        preferred_element_type=jnp.float32)                      # (L, L)
    if has_mask:
        s = s + mask_ref[0, 0].astype(jnp.float32)

    # Softmax in f32 (matches torch softmax(dtype=float32)); divide -> EUP reciprocal.
    m = jnp.max(s, axis=-1, keepdims=True)
    p = jnp.exp(s - m)
    probs = p * pl.reciprocal(jnp.sum(p, axis=-1, keepdims=True), approx=True)

    if out_weights:
        w_ref[0, 0] = probs.astype(w_ref.dtype)

    # attention_dropout = 0 / eval mode -> dropout is identity.
    ctx = jnp.dot(probs.astype(cdt), v.astype(cdt),
                  preferred_element_type=jnp.float32)                            # (L, D)

    # out_proj distributed over the head reduction: out = sum_h ctx_h @ Wo_h  (+ bo once).
    acc_ref[...] += jnp.dot(ctx.astype(cdt), wo_ref[0],
                            preferred_element_type=jnp.float32)                  # (L, E)

    @pl.when(h == pl.num_programs(1) - 1)
    def _finalize():
        out_ref[0] = (acc_ref[...] + bo_ref[...].astype(jnp.float32)).astype(out_ref.dtype)


# ---------------- One-time parameter preparation ----------------
def prepare_params(params, num_heads=NUM_HEADS, compute_dtype=jnp.float32):
    """Pre-transpose + head-split weights once; fold 1/sqrt(D) into the Q slice.

    PyTorch Linear weights are (out, in); we store per-head, already-transposed slabs:
      Wq/Wk/Wv: (H, E, D)   Wo: (H, D, E)   biases: (H, 1, D) / (1, E)
    so BlockSpec index_maps select a head with zero in-kernel slicing. compute_dtype=bf16
    is the production setting (native MXU input, half the DMA / VMEM bytes).
    """
    E = params["q_w"].shape[0]
    D = E // num_heads
    scale = D ** (-0.5)

    def split_cols(w_t):                     # (E_in, E_out) -> (H, E_in, D)
        return w_t.reshape(E, num_heads, D).transpose(1, 0, 2)

    fused = {
        "wq": split_cols((params["q_w"] * scale).T),
        "wk": split_cols(params["k_w"].T),
        "wv": split_cols(params["v_w"].T),
        "wo": params["o_w"].T.reshape(num_heads, D, E),
        "bq": (params["q_b"] * scale).reshape(num_heads, 1, D),
        "bk": params["k_b"].reshape(num_heads, 1, D),
        "bv": params["v_b"].reshape(num_heads, 1, D),
        "bo": params["o_b"].reshape(1, E),
    }
    return {k: v.astype(compute_dtype) for k, v in fused.items()}


# ---------------- Full module forward ----------------
def siglip_attention_forward(fused, hidden_states, attention_mask=None,
                             output_attentions=True):
    """Matches SigLipAttention.forward: returns (attn_output, attn_weights).
    attention_mask, if given, must be additive with shape (B, 1, L, L).
    Set output_attentions=False to skip the O(B*H*L^2) attn_weights HBM writeback."""
    B, L, E = hidden_states.shape
    H, _, D = fused["wq"].shape
    cdt = fused["wq"].dtype
    x = hidden_states.astype(cdt)            # feed activations in the MXU compute dtype
    has_mask = attention_mask is not None

    kernel = functools.partial(_siglip_attn_kernel, has_mask=has_mask,
                               out_weights=output_attentions)

    in_specs = [
        pl.BlockSpec((1, L, E), lambda b, h: (b, 0, 0)),   # x: constant over h -> 1 DMA/batch
        pl.BlockSpec((1, E, D), lambda b, h: (h, 0, 0)),   # Wq (H,E,D), scale folded
        pl.BlockSpec((1, 1, D), lambda b, h: (h, 0, 0)),   # bq
        pl.BlockSpec((1, E, D), lambda b, h: (h, 0, 0)),   # Wk
        pl.BlockSpec((1, 1, D), lambda b, h: (h, 0, 0)),   # bk
        pl.BlockSpec((1, E, D), lambda b, h: (h, 0, 0)),   # Wv
        pl.BlockSpec((1, 1, D), lambda b, h: (h, 0, 0)),   # bv
        pl.BlockSpec((1, D, E), lambda b, h: (h, 0, 0)),   # Wo (H,D,E)
        pl.BlockSpec((1, E),    lambda b, h: (0, 0)),      # bo
    ]
    args = [x, fused["wq"], fused["bq"], fused["wk"], fused["bk"],
            fused["wv"], fused["bv"], fused["wo"], fused["bo"]]
    if has_mask:
        in_specs.append(pl.BlockSpec((1, 1, L, L), lambda b, h: (b, 0, 0, 0)))
        args.append(attention_mask)

    out_shapes = [jax.ShapeDtypeStruct((B, L, E), hidden_states.dtype)]
    out_specs = [pl.BlockSpec((1, L, E), lambda b, h: (b, 0, 0))]
    if output_attentions:
        # One (1,1,L,L) head slab per step (not a whole (1,H,L,L) block) -> small VMEM blocks.
        out_shapes.append(jax.ShapeDtypeStruct((B, H, L, L), hidden_states.dtype))
        out_specs.append(pl.BlockSpec((1, 1, L, L), lambda b, h: (b, h, 0, 0)))

    results = pl.pallas_call(
        kernel,
        out_shape=tuple(out_shapes),
        grid_spec=pltpu.PrefetchScalarGridSpec(
            num_scalar_prefetch=0,
            grid=(B, H),                                   # batch parallel, head = reduction
            in_specs=in_specs,
            out_specs=tuple(out_specs),
            scratch_shapes=[pltpu.VMEM((L, E), jnp.float32)],   # resident out_proj accumulator
        ),
        compiler_params=pltpu.CompilerParams(
            dimension_semantics=("parallel", "arbitrary"),
            vmem_limit_bytes=48 * 1024 * 1024,
        ),
    )(*args)

    if output_attentions:
        return results[0], results[1]
    return results[0], None


# ---------------- Reference (pure JAX) for sanity ----------------
def reference_forward(params, hidden_states, attention_mask=None,
                      num_heads=NUM_HEADS, head_dim=HEAD_DIM):
    B, L, E = hidden_states.shape
    H, D = num_heads, head_dim
    scale = D ** (-0.5)
    q = hidden_states @ params["q_w"].T + params["q_b"]
    k = hidden_states @ params["k_w"].T + params["k_b"]
    v = hidden_states @ params["v_w"].T + params["v_b"]
    q = q.reshape(B, L, H, D).transpose(0, 2, 1, 3)
    k = k.reshape(B, L, H, D).transpose(0, 2, 1, 3)
    v = v.reshape(B, L, H, D).transpose(0, 2, 1, 3)
    w = jnp.einsum("bhqd,bhkd->bhqk", q, k) * scale
    if attention_mask is not None:
        w = w + attention_mask
    w = jax.nn.softmax(w.astype(jnp.float32), axis=-1).astype(q.dtype)
    o = jnp.einsum("bhqk,bhkd->bhqd", w, v)
    o = o.transpose(0, 2, 1, 3).reshape(B, L, E)
    o = o @ params["o_w"].T + params["o_b"]
    return o, w


def init_params(key):
    ks = jax.random.split(key, 8)
    s = 0.02
    return {
        "q_w": jax.random.normal(ks[0], (HIDDEN, HIDDEN), jnp.float32) * s,
        "q_b": jax.random.normal(ks[1], (HIDDEN,), jnp.float32) * s,
        "k_w": jax.random.normal(ks[2], (HIDDEN, HIDDEN), jnp.float32) * s,
        "k_b": jax.random.normal(ks[3], (HIDDEN,), jnp.float32) * s,
        "v_w": jax.random.normal(ks[4], (HIDDEN, HIDDEN), jnp.float32) * s,
        "v_b": jax.random.normal(ks[5], (HIDDEN,), jnp.float32) * s,
        "o_w": jax.random.normal(ks[6], (HIDDEN, HIDDEN), jnp.float32) * s,
        "o_b": jax.random.normal(ks[7], (HIDDEN,), jnp.float32) * s,
    }


if __name__ == "__main__":
    key = jax.random.PRNGKey(0)
    pkey, xkey, mkey = jax.random.split(key, 3)
    params = init_params(pkey)
    hidden_states = jax.random.normal(xkey, (BATCH, SEQ, HIDDEN), jnp.float32)
    ref_out, ref_w = reference_forward(params, hidden_states, None)

    # 1) f32 params, no mask, with attn_weights (matches the module's return signature).
    #    Tolerances loosened slightly because the softmax uses the EUP approx reciprocal.
    fused_f32 = prepare_params(params, NUM_HEADS, compute_dtype=jnp.float32)
    out, attn_w = siglip_attention_forward(fused_f32, hidden_states, attention_mask=None)
    out, attn_w = jax.block_until_ready((out, attn_w))
    assert out.shape == (BATCH, SEQ, HIDDEN)
    assert attn_w.shape == (BATCH, NUM_HEADS, SEQ, SEQ)
    assert jnp.allclose(out, ref_out, atol=2e-3, rtol=2e-3)
    assert jnp.allclose(attn_w, ref_w, atol=5e-3, rtol=5e-3)

    # 2) with an additive (B, 1, L, L) attention mask
    mask = jax.random.normal(mkey, (BATCH, 1, SEQ, SEQ), jnp.float32)
    ref_out_m, ref_w_m = reference_forward(params, hidden_states, mask)
    out_m, attn_w_m = siglip_attention_forward(fused_f32, hidden_states, attention_mask=mask)
    out_m, attn_w_m = jax.block_until_ready((out_m, attn_w_m))
    assert jnp.allclose(out_m, ref_out_m, atol=2e-3, rtol=2e-3)
    assert jnp.allclose(attn_w_m, ref_w_m, atol=5e-3, rtol=5e-3)

    # 3) production path: bf16 weights/activations + skip attn_weights writeback entirely
    fused_bf16 = prepare_params(params, NUM_HEADS, compute_dtype=jnp.bfloat16)
    out_fast, none_w = siglip_attention_forward(fused_bf16, hidden_states,
                                                output_attentions=False)
    out_fast = jax.block_until_ready(out_fast)
    assert none_w is None
    assert jnp.allclose(out_fast, ref_out, atol=5e-3, rtol=5e-2)

    print("KERNEL_OK")
</pallas_src>

<mosaic_0001>
module attributes {stable_mosaic.version = 11 : i64} {
  func.func @_siglip_attn_kernel(%arg0: i32, %arg1: i32, %arg2: memref<1x8x32xf32, #tpu.memory_space<vmem>>, %arg3: memref<1x32x8xf32, #tpu.memory_space<vmem>>, %arg4: memref<1x1x8xf32, #tpu.memory_space<vmem>>, %arg5: memref<1x32x8xf32, #tpu.memory_space<vmem>>, %arg6: memref<1x1x8xf32, #tpu.memory_space<vmem>>, %arg7: memref<1x32x8xf32, #tpu.memory_space<vmem>>, %arg8: memref<1x1x8xf32, #tpu.memory_space<vmem>>, %arg9: memref<1x8x32xf32, #tpu.memory_space<vmem>>, %arg10: memref<1x32xf32, #tpu.memory_space<vmem>>, %arg11: memref<1x8x32xf32, #tpu.memory_space<vmem>>, %arg12: memref<1x1x8x8xf32, #tpu.memory_space<vmem>>, %arg13: memref<8x32xf32, #tpu.memory_space<vmem>>) attributes {dimension_semantics = [#tpu.dimension_semantics<parallel>, #tpu.dimension_semantics<arbitrary>], iteration_bounds = array<i64: 2, 4>, scalar_prefetch = 0 : i64, scratch_operands = 1 : i64, tpu.core_type = #tpu.core_type<tc>, window_params = [{transform_indices = @transform_0, window_bounds = array<i64: 1, 8, 32>}, {transform_indices = @transform_1, window_bounds = array<i64: 1, 32, 8>}, {transform_indices = @transform_2, window_bounds = array<i64: 1, 1, 8>}, {transform_indices = @transform_3, window_bounds = array<i64: 1, 32, 8>}, {transform_indices = @transform_4, window_bounds = array<i64: 1, 1, 8>}, {transform_indices = @transform_5, window_bounds = array<i64: 1, 32, 8>}, {transform_indices = @transform_6, window_bounds = array<i64: 1, 1, 8>}, {transform_indices = @transform_7, window_bounds = array<i64: 1, 8, 32>}, {pipeline_mode = #tpu.pipeline_mode<synchronous>, transform_indices = @transform_8, window_bounds = array<i64: 1, 32>}, {transform_indices = @transform_9, window_bounds = array<i64: 1, 8, 32>}, {transform_indices = @transform_10, window_bounds = array<i64: 1, 1, 8, 8>}]} {
    %c0_i32 = arith.constant 0 : i32
    %0 = arith.cmpi eq, %arg1, %c0_i32 : i32
    %1 = arith.extui %0 : i1 to i32
    %c0_i32_0 = arith.constant 0 : i32
    %2 = arith.cmpi ne, %1, %c0_i32_0 : i32
    scf.if %2 {
      %cst_40 = arith.constant 0.000000e+00 : f32
      %50 = vector.broadcast %cst_40 : f32 to vector<8x32xf32>
      %c0_41 = arith.constant 0 : index
      %c0_42 = arith.constant 0 : index
      %51 = vector.load %arg13[%c0_41, %c0_42] : memref<8x32xf32, #tpu.memory_space<vmem>>, vector<8x32xf32>
      tpu.vector_store %arg13[%c0_41, %c0_42], %50 {strides = array<i32>} : memref<8x32xf32, #tpu.memory_space<vmem>>, vector<8x32xf32>,
    } else {
    }
    %c0 = arith.constant 0 : index
    %c0_1 = arith.constant 0 : index
    %c0_2 = arith.constant 0 : index
    %3 = vector.load %arg2[%c0, %c0_1, %c0_2] : memref<1x8x32xf32, #tpu.memory_space<vmem>>, vector<1x8x32xf32>
    %4 = vector.shape_cast %3 : vector<1x8x32xf32> to vector<8x32xf32>
    %c0_3 = arith.constant 0 : index
    %c0_4 = arith.constant 0 : index
    %c0_5 = arith.constant 0 : index
    %5 = vector.load %arg3[%c0_3, %c0_4, %c0_5] : memref<1x32x8xf32, #tpu.memory_space<vmem>>, vector<1x32x8xf32>
    %6 = vector.shape_cast %5 : vector<1x32x8xf32> to vector<32x8xf32>
    %cst = arith.constant dense<0.000000e+00> : vector<8x8xf32>
    %7 = tpu.matmul %4, %6, %cst {dimension_numbers = #tpu.dot_dimension_numbers<[1], [0], [0], [1], [0, 0, 1, 1], [], []>} : vector<8x32xf32>, vector<32x8xf32>, vector<8x8xf32> -> vector<8x8xf32>
    %c0_6 = arith.constant 0 : index
    %c0_7 = arith.constant 0 : index
    %c0_8 = arith.constant 0 : index
    %8 = vector.load %arg4[%c0_6, %c0_7, %c0_8] : memref<1x1x8xf32, #tpu.memory_space<vmem>>, vector<1x1x8xf32>
    %9 = vector.shape_cast %8 : vector<1x1x8xf32> to vector<1x8xf32>
    %10 = vector.broadcast %9 : vector<1x8xf32> to vector<8x8xf32>
    %11 = arith.addf %7, %10 : vector<8x8xf32>
    %c0_9 = arith.constant 0 : index
    %c0_10 = arith.constant 0 : index
    %c0_11 = arith.constant 0 : index
    %12 = vector.load %arg5[%c0_9, %c0_10, %c0_11] : memref<1x32x8xf32, #tpu.memory_space<vmem>>, vector<1x32x8xf32>
    %13 = vector.shape_cast %12 : vector<1x32x8xf32> to vector<32x8xf32>
    %cst_12 = arith.constant dense<0.000000e+00> : vector<8x8xf32>
    %14 = tpu.matmul %4, %13, %cst_12 {dimension_numbers = #tpu.dot_dimension_numbers<[1], [0], [0], [1], [0, 0, 1, 1], [], []>} : vector<8x32xf32>, vector<32x8xf32>, vector<8x8xf32> -> vector<8x8xf32>
    %c0_13 = arith.constant 0 : index
    %c0_14 = arith.constant 0 : index
    %c0_15 = arith.constant 0 : index
    %15 = vector.load %arg6[%c0_13, %c0_14, %c0_15] : memref<1x1x8xf32, #tpu.memory_space<vmem>>, vector<1x1x8xf32>
    %16 = vector.shape_cast %15 : vector<1x1x8xf32> to vector<1x8xf32>
    %17 = vector.broadcast %16 : vector<1x8xf32> to vector<8x8xf32>
    %18 = arith.addf %14, %17 : vector<8x8xf32>
    %c0_16 = arith.constant 0 : index
    %c0_17 = arith.constant 0 : index
    %c0_18 = arith.constant 0 : index
    %19 = vector.load %arg7[%c0_16, %c0_17, %c0_18] : memref<1x32x8xf32, #tpu.memory_space<vmem>>, vector<1x32x8xf32>
    %20 = vector.shape_cast %19 : vector<1x32x8xf32> to vector<32x8xf32>
    %cst_19 = arith.constant dense<0.000000e+00> : vector<8x8xf32>
    %21 = tpu.matmul %4, %20, %cst_19 {dimension_numbers = #tpu.dot_dimension_numbers<[1], [0], [0], [1], [0, 0, 1, 1], [], []>} : vector<8x32xf32>, vector<32x8xf32>, vector<8x8xf32> -> vector<8x8xf32>
    %c0_20 = arith.constant 0 : index
    %c0_21 = arith.constant 0 : index
    %c0_22 = arith.constant 0 : index
    %22 = vector.load %arg8[%c0_20, %c0_21, %c0_22] : memref<1x1x8xf32, #tpu.memory_space<vmem>>, vector<1x1x8xf32>
    %23 = vector.shape_cast %22 : vector<1x1x8xf32> to vector<1x8xf32>
    %24 = vector.broadcast %23 : vector<1x8xf32> to vector<8x8xf32>
    %25 = arith.addf %21, %24 : vector<8x8xf32>
    %cst_23 = arith.constant dense<0.000000e+00> : vector<8x8xf32>
    %26 = tpu.matmul %11, %18, %cst_23 {dimension_numbers = #tpu.dot_dimension_numbers<[1], [1], [0], [0], [0, 0, 1, 0], [], []>} : vector<8x8xf32>, vector<8x8xf32>, vector<8x8xf32> -> vector<8x8xf32>
    %cst_24 = arith.constant dense<0xFF800000> : vector<8xf32>
    %27 = vector.multi_reduction <maximumf>, %26, %cst_24 [1] : vector<8x8xf32> to vector<8xf32>
    %28 = vector.shape_cast %27 : vector<8xf32> to vector<8x1xf32>
    %29 = vector.broadcast %28 : vector<8x1xf32> to vector<8x8xf32>
    %30 = arith.subf %26, %29 : vector<8x8xf32>
    %31 = math.exp %30 : vector<8x8xf32>
    %cst_25 = arith.constant dense<0.000000e+00> : vector<8xf32>
    %32 = vector.multi_reduction <add>, %31, %cst_25 [1] : vector<8x8xf32> to vector<8xf32>
    %33 = vector.shape_cast %32 : vector<8xf32> to vector<8x1xf32>
    %34 = tpu.reciprocal %33 {approx = true} : vector<8x1xf32> -> vector<8x1xf32>
    %35 = vector.broadcast %34 : vector<8x1xf32> to vector<8x8xf32>
    %36 = arith.mulf %31, %35 : vector<8x8xf32>
    %c0_26 = arith.constant 0 : index
    %c0_27 = arith.constant 0 : index
    %c0_28 = arith.constant 0 : index
    %c0_29 = arith.constant 0 : index
    %37 = vector.load %arg12[%c0_26, %c0_27, %c0_28, %c0_29] : memref<1x1x8x8xf32, #tpu.memory_space<vmem>>, vector<1x1x8x8xf32>
    %38 = vector.shape_cast %37 : vector<1x1x8x8xf32> to vector<8x8xf32>
    %39 = vector.shape_cast %36 : vector<8x8xf32> to vector<1x1x8x8xf32>
    tpu.vector_store %arg12[%c0_26, %c0_27, %c0_28, %c0_29], %39 {strides = array<i32>} : memref<1x1x8x8xf32, #tpu.memory_space<vmem>>, vector<1x1x8x8xf32>,
    %cst_30 = arith.constant dense<0.000000e+00> : vector<8x8xf32>
    %40 = tpu.matmul %36, %25, %cst_30 {dimension_numbers = #tpu.dot_dimension_numbers<[1], [0], [0], [1], [0, 0, 1, 1], [], []>} : vector<8x8xf32>, vector<8x8xf32>, vector<8x8xf32> -> vector<8x8xf32>
    %c0_31 = arith.constant 0 : index
    %c0_32 = arith.constant 0 : index
    %41 = vector.load %arg13[%c0_31, %c0_32] : memref<8x32xf32, #tpu.memory_space<vmem>>, vector<8x32xf32>
    %c0_33 = arith.constant 0 : index
    %c0_34 = arith.constant 0 : index
    %c0_35 = arith.constant 0 : index
    %42 = vector.load %arg9[%c0_33, %c0_34, %c0_35] : memref<1x8x32xf32, #tpu.memory_space<vmem>>, vector<1x8x32xf32>
    %43 = vector.shape_cast %42 : vector<1x8x32xf32> to vector<8x32xf32>
    %cst_36 = arith.constant dense<0.000000e+00> : vector<8x32xf32>
    %44 = tpu.matmul %40, %43, %cst_36 {dimension_numbers = #tpu.dot_dimension_numbers<[1], [0], [0], [1], [0, 0, 1, 1], [], []>} : vector<8x8xf32>, vector<8x32xf32>, vector<8x32xf32> -> vector<8x32xf32>
    %45 = arith.addf %41, %44 : vector<8x32xf32>
    %c0_37 = arith.constant 0 : index
    %c0_38 = arith.constant 0 : index
    %46 = vector.load %arg13[%c0_37, %c0_38] : memref<8x32xf32, #tpu.memory_space<vmem>>, vector<8x32xf32>
    tpu.vector_store %arg13[%c0_37, %c0_38], %45 {strides = array<i32>} : memref<8x32xf32, #tpu.memory_space<vmem>>, vector<8x32xf32>,
    %c3_i32 = arith.constant 3 : i32
    %47 = arith.cmpi eq, %arg1, %c3_i32 : i32
    %48 = arith.extui %47 : i1 to i32
    %c0_i32_39 = arith.constant 0 : i32
    %49 = arith.cmpi ne, %48, %c0_i32_39 : i32
    scf.if %49 {
      %c0_40 = arith.constant 0 : index
      %c0_41 = arith.constant 0 : index
      %50 = vector.load %arg13[%c0_40, %c0_41] : memref<8x32xf32, #tpu.memory_space<vmem>>, vector<8x32xf32>
      %c0_42 = arith.constant 0 : index
      %c0_43 = arith.constant 0 : index
      %51 = vector.load %arg10[%c0_42, %c0_43] : memref<1x32xf32, #tpu.memory_space<vmem>>, vector<1x32xf32>
      %52 = vector.broadcast %51 : vector<1x32xf32> to vector<8x32xf32>
      %53 = arith.addf %50, %52 : vector<8x32xf32>
      %c0_44 = arith.constant 0 : index
      %c0_45 = arith.constant 0 : index
      %c0_46 = arith.constant 0 : index
      %54 = vector.load %arg11[%c0_44, %c0_45, %c0_46] : memref<1x8x32xf32, #tpu.memory_space<vmem>>, vector<1x8x32xf32>
      %55 = vector.shape_cast %54 : vector<1x8x32xf32> to vector<8x32xf32>
      %56 = vector.shape_cast %53 : vector<8x32xf32> to vector<1x8x32xf32>
      tpu.vector_store %arg11[%c0_44, %c0_45, %c0_46], %56 {strides = array<i32>} : memref<1x8x32xf32, #tpu.memory_space<vmem>>, vector<1x8x32xf32>,
    } else {
    }
    return
  }
  func.func @transform_0(%arg0: i32, %arg1: i32) -> (i32, i32, i32) {
    %c0_i32 = arith.constant 0 : i32
    %c0_i32_0 = arith.constant 0 : i32
    %c0_i32_1 = arith.constant 0 : i32
    return %arg0, %c0_i32, %c0_i32_0 : i32, i32, i32
  }
  func.func @transform_1(%arg0: i32, %arg1: i32) -> (i32, i32, i32) {
    %c0_i32 = arith.constant 0 : i32
    %c0_i32_0 = arith.constant 0 : i32
    %c0_i32_1 = arith.constant 0 : i32
    return %arg1, %c0_i32, %c0_i32_0 : i32, i32, i32
  }
  func.func @transform_2(%arg0: i32, %arg1: i32) -> (i32, i32, i32) {
    %c0_i32 = arith.constant 0 : i32
    %c0_i32_0 = arith.constant 0 : i32
    %c0_i32_1 = arith.constant 0 : i32
    return %arg1, %c0_i32, %c0_i32_0 : i32, i32, i32
  }
  func.func @transform_3(%arg0: i32, %arg1: i32) -> (i32, i32, i32) {
    %c0_i32 = arith.constant 0 : i32
    %c0_i32_0 = arith.constant 0 : i32
    %c0_i32_1 = arith.constant 0 : i32
    return %arg1, %c0_i32, %c0_i32_0 : i32, i32, i32
  }
  func.func @transform_4(%arg0: i32, %arg1: i32) -> (i32, i32, i32) {
    %c0_i32 = arith.constant 0 : i32
    %c0_i32_0 = arith.constant 0 : i32
    %c0_i32_1 = arith.constant 0 : i32
    return %arg1, %c0_i32, %c0_i32_0 : i32, i32, i32
  }
  func.func @transform_5(%arg0: i32, %arg1: i32) -> (i32, i32, i32) {
    %c0_i32 = arith.constant 0 : i32
    %c0_i32_0 = arith.constant 0 : i32
    %c0_i32_1 = arith.constant 0 : i32
    return %arg1, %c0_i32, %c0_i32_0 : i32, i32, i32
  }
  func.func @transform_6(%arg0: i32, %arg1: i32) -> (i32, i32, i32) {
    %c0_i32 = arith.constant 0 : i32
    %c0_i32_0 = arith.constant 0 : i32
    %c0_i32_1 = arith.constant 0 : i32
    return %arg1, %c0_i32, %c0_i32_0 : i32, i32, i32
  }
  func.func @transform_7(%arg0: i32, %arg1: i32) -> (i32, i32, i32) {
    %c0_i32 = arith.constant 0 : i32
    %c0_i32_0 = arith.constant 0 : i32
    %c0_i32_1 = arith.constant 0 : i32
    return %arg1, %c0_i32, %c0_i32_0 : i32, i32, i32
  }
  func.func @transform_8(%arg0: i32, %arg1: i32) -> (i32, i32) {
    %c0_i32 = arith.constant 0 : i32
    %c0_i32_0 = arith.constant 0 : i32
    %c0_i32_1 = arith.constant 0 : i32
    return %c0_i32, %c0_i32_0 : i32, i32
  }
  func.func @transform_9(%arg0: i32, %arg1: i32) -> (i32, i32, i32) {
    %c0_i32 = arith.constant 0 : i32
    %c0_i32_0 = arith.constant 0 : i32
    %c0_i32_1 = arith.constant 0 : i32
    return %arg0, %c0_i32, %c0_i32_0 : i32, i32, i32
  }
  func.func @transform_10(%arg0: i32, %arg1: i32) -> (i32, i32, i32, i32) {
    %c0_i32 = arith.constant 0 : i32
    %c0_i32_0 = arith.constant 0 : i32
    %c0_i32_1 = arith.constant 0 : i32
    return %arg0, %arg1, %c0_i32, %c0_i32_0 : i32, i32, i32, i32
  }
}

</mosaic_0001>

<bundles_post_ra>
// kernel: tpu_custom_call.1
= control target key start
LH: loop header
LB: loop body
LE: loop exit
PB: predicated region body
PF: predicated region fallthrough
CT: control target
= control target key end

     0   :  { %s1984_s0 = inlined_call_operand.vmem [shape: f32[2,8,32], index: 0, kind: input, shape index: {}]   ;;  %s1985_s1 = inlined_call_operand.vmem [shape: f32[4,32,8], index: 1, kind: input, shape index: {}]   ;;  %s1986_s2 = inlined_call_operand.vmem [shape: f32[4,1,8], index: 2, kind: input, shape index: {}]   ;;  %s1987_s3 = inlined_call_operand.vmem [shape: f32[4,32,8], index: 3, kind: input, shape index: {}]   ;;  %s1988_s4 = inlined_call_operand.vmem [shape: f32[4,1,8], index: 4, kind: input, shape index: {}]   ;;  %s1989_s5 = inlined_call_operand.vmem [shape: f32[4,32,8], index: 5, kind: input, shape index: {}]   ;;  %s1990_s6 = inlined_call_operand.vmem [shape: f32[4,1,8], index: 6, kind: input, shape index: {}]   ;;  %s1991_s7 = inlined_call_operand.vmem [shape: f32[4,8,32], index: 7, kind: input, shape index: {}]   ;;  %s1992_s8 = inlined_call_operand.vmem [shape: f32[1,32], index: 8, kind: input, shape index: {}]   ;;  %s1993_s9 = inlined_call_operand.hbm [shape: f32[2,8,32], index: 9, kind: output, shape index: {0}]   ;;  %s1994_s10 = inlined_call_operand.hbm [shape: f32[2,4,8,8], index: 10, kind: output, shape index: {1}]  }
   0x1   :  { %2017 = sst [smem:[#allocation26_spill]] %s1984_s0 }
   0x2   :  { %2018 = sst [smem:[#allocation27_spill]] %s1985_s1 }
   0x3   :  { %2019 = sst [smem:[#allocation28_spill]] %s1993_s9 }
   0x4   :  { %2020 = sst [smem:[#allocation29_spill]] %s1994_s10 }
   0x5   :  { %16 = vsyncpa [#allocation4], 0 }
   0x6   :  { %18 = vsyncpa [#allocation4 + $0x1], 0 }
   0x7   :  { %19 = vsyncpa [#allocation6], 0 }
   0x8   :  { %21 = vsyncpa [#allocation6 + $0x1], 0  ;;  %s1665_s13 = smov 0   ;;  %s1667_s14 = smov 0  }
   0x9   :  { %s1669_s15 = smov 0   ;;  %s1671_s16 = smov 0  }
   0xa   :  { %s1673_s17 = smov 0   ;;  %s1675_s18 = smov 0  }
   0xb   :  { %s1677_s19 = smov 0   ;;  %s1679_s20 = smov 0  }
   0xc   :  { %s1681_s21 = smov 0   ;;  %s1683_s22 = smov 0  }
   0xd   :  { %s1685_s23 = smov 0  }
   0xe LB: > { %2021 = sst [smem:[#allocation9_spill]] %s1562_s13  ;;  %s1219_s24 = sadd.s32 4294967295, %s1602_s23   ;;  %s1602_s23 = sphi %s1685_s23, %s27_s23   ;;  %s1598_s22 = sphi %s1683_s22, %s2071_s22   ;;  %s1594_s21 = sphi %s1681_s21, %s2070_s21   ;;  %s1590_s20 = sphi %s1679_s20, %s2069_s20   ;;  %s1586_s19 = sphi %s1677_s19, %s2068_s19   ;;  %s1582_s18 = sphi %s1675_s18, %s2067_s18   ;;  %s1578_s17 = sphi %s1673_s17, %s2066_s17   ;;  %s1574_s16 = sphi %s1671_s16, %s2065_s16   ;;  %s1570_s15 = sphi %s1669_s15, %s2064_s15   ;;  %s1566_s14 = sphi %s1667_s14, %s2063_s14   ;;  %s1562_s13 = sphi %s1665_s13, %s2062_s13  }
   0xf   : > { %2022 = sst [smem:[#allocation10_spill]] %s1566_s14  ;;  %s1220_s25 = sadd.s32 4294967294, %s1602_s23  }
  0x10   : > { %2023 = sst [smem:[#allocation11_spill]] %s1570_s15  ;;  %s36_s26 = sadd.s32 1, %s1594_s21 }
  0x11   : > { %2024 = sst [smem:[#allocation12_spill]] %s1574_s16  ;;  %s39_s27 = sadd.s32 1, %s1598_s22 }
  0x12   : > { %2025 = sst [smem:[#allocation13_spill]] %s1578_s17  ;;  %p37_p0 = scmp.ge.s32.totalorder %s36_s26, 4 }
  0x13   : > { %2026 = sst [smem:[#allocation14_spill]] %s1582_s18  ;;  %s275_s28 = sadd.s32 1, %s1582_s18 }
  0x14   : > { %2027 = sst [smem:[#allocation15_spill]] %s1594_s21  ;;  %p285_p1 = scmp.ne.s32.totalorder %s1582_s18, %s1578_s17 }
  0x15   : > { %2028 = sst [smem:[#allocation16_spill]] %s1598_s22  ;;  %p1727_p2 = scmp.eq.s32.totalorder %s1219_s24, 7 }
  0x16   : > { %2029 = sst [smem:[#allocation17_spill]] %s1602_s23  ;;  %s2073_s26 = smov (%p37_p0, %s36_s26), 0 }
  0x17   : > { %2031 = sst [smem:[#allocation18_spill]] %s2073_s26  ;;  %s2075_s27 = smov (!%p37_p0, %s39_s27), %s1598_s22 }
  0x18   : > { %p1736_p3 = por %p1727_p2, %p285_p1  ;;  %p291_p4 = scmp.ne.s32.totalorder %s1578_s17, %s1574_s16 }
  0x19   : > { %p41_p5 = scmp.ge.s32.totalorder %s2075_s27, 2  ;;  %p1742_p6 = scmp.eq.s32.totalorder %s1220_s25, 7 }
  0x1a   : > { %s2032_s30 = scalar_select %p1736_p3, 1, 0 }
  0x1b   : > { %s299_s12 = ssub.s32 %s1594_s21, %s2073_s26  ;;  %s303_s24 = sadd.s32 1, %s1570_s15 }
  0x1c   : > { %2033 = sst [smem:[#allocation19_spill]] %s2032_s30  ;;  %s2077_s27 = smov (%p41_p5, %s2075_s27), 0 }
  0x1d   : > { %2035 = sst [smem:[#allocation20_spill]] %s2077_s27  ;;  %p1753_p7 = por %p1742_p6, %p291_p4 }
  0x1e   : > { %p313_p8 = scmp.ne.s32.totalorder %s1570_s15, %s1566_s14  ;;  %s272_s16 = ssub.s32 %s1598_s22, %s2077_s27 }
  0x1f   : > { %s2036_s10 = scalar_select %p1753_p7, 1, 0 }
  0x20   : > { %p319_p9 = scmp.ne.s32.totalorder %s1566_s14, %s1562_s13  ;;  %p273_p10 = scmp.eq.s32.totalorder %s272_s16, 0 }
  0x21   : > { %2037 = sst [smem:[#allocation21_spill]] %s2036_s10  ;;  %s300_s25 = sor.u32 %s299_s12, %s272_s16 }
  0x22   : > { %p301_p11 = scmp.eq.s32.totalorder %s300_s25, 0  ;;  %p1765_p12 = por %p313_p8, %p1727_p2 }
  0x23   : > { %s1770_s26 = scalar_select %p273_p10, %s1582_s18, %s275_s28  }
  0x24   : > { %s2038_s9 = scalar_select %p1765_p12, 1, 0 }
  0x25   : > { %2040 = sst [smem:[#allocation23_spill]] %s1770_s26  ;;  %p1777_p13 = por %p319_p9, %p1742_p6 }
  0x26   : > { %2039 = sst [smem:[#allocation22_spill]] %s2038_s9  ;;  %p1223_p0 = scmp.ge.s32.totalorder %s1602_s23, 1 }
  0x27   : > { %s1773_s21 = scalar_select %p301_p11, %s1570_s15, %s303_s24  }
  0x28   : > { %s2042_s30 = scalar_select %p1777_p13, 1, 0 }
  0x29   : > { %2041 = sst [smem:[#allocation24_spill]] %s1773_s21  ;;  %p397_p1 = scmp.lt.s32.totalorder %s1602_s23, 9 }
  0x2a   : > { %2043 = sst [smem:[#allocation25_spill]] %s2042_s30 }
  0x2b   : > { %p398_p4 = pnand %p1223_p0, %p397_p1 }
  0x2c   : > { %s2004_s16 = sand.u32 (!%p398_p4), 1, %s1578_s17   ;;  %s2005_s28 = sand.u32 (!%p398_p4), 1, %s1566_s14  }
  0x2d   : > { %401 = sbr.rel (%p398_p4) target bundleno = 1303 (0x517), region = 56  ;;  %s1787_s29 = sshll.u32 (!%p398_p4), %s2004_s16, 3 }
  0x2e   : > { %s1791_s11 = sshll.u32 (!%p398_p4), %s2005_s28, 3  ;;  %p467_p2 = scmp.lt.s32.totalorder (!%p398_p4), %s1590_s20, 1 }
  0x2f   : > { %p471_p5 = scmp.lt.s32.totalorder (!%p398_p4), %s1586_s19, 3  ;;  %s2044_s0 = sld [smem:[#allocation26_spill]] (!%p398_p4) }
  0x30   : > { %s2045_s1 = sld [smem:[#allocation27_spill]] (!%p398_p4)  ;;  %s459_s10 = scalar_lea.vmem (!%p398_p4), [#allocation3], %s1787_s29 }
  0x31   : > { %s466_s23 = scalar_lea.vmem (!%p398_p4), [#allocation5], %s1791_s11  ;;  %p1234_p6 = scmp.ne.s32.totalorder (!%p398_p4), %s1586_s19, 0 }
  0x34   : > { %s468_s12 = scalar_select %p467_p2, %s1590_s20, 1 }
  0x35   : > { %s1797_s24 = scalar_select %p471_p5, %s1586_s19, 3 }
  0x36   : > { %s1226_s25 = sshll.u32 %s468_s12, 3  ;;  %502 = sbr.rel (%p1234_p6) target bundleno = 61 (0x3d), region = 60  ;;  %vm503_vm0 = vcmask (!%p1234_p6), 261120   ;;  %v1604_v0 = vmov (!%p1234_p6), 0.0  }
  0x37   : > { %s1802_s16 = scalar_lea.vmem %s2044_s0, %s1226_s25  ;;  %s1254_s28 = sshll.u32 %s1797_s24, 5  ;;  %504 = vst.msk [vmem:[#allocation2] sm:$0xff] (!%p1234_p6), %vm503_vm0, %v1604_v0 }
  0x38   : > { %s1808_s21 = scalar_lea.vmem %s2045_s1, %s1254_s28  ;;  %s483_s9 = scalar_lea.vmem %s1987_s3, %s1254_s28 }
  0x39   : > { %s486_s22 = scalar_lea.vmem %s1988_s4, %s1797_s24  ;;  %s1824_s0 = scalar_lea.vmem %s1989_s5, %s1254_s28 }
  0x3a   : > { %s494_s1 = scalar_lea.vmem %s1990_s6, %s1797_s24  ;;  %s1233_s17 = sshll.u32 %s1797_s24, 3 }
  0x3b   : > { %s1834_s13 = scalar_lea.vmem %s1991_s7, %s1233_s17 }
  0x3d PF: > { %v591_v1 = vld [vmem:[%s483_s9] sm:$0xff]  ;;  %v592_v2 = vld [vmem:[%s483_s9 + $0x8] sm:$0xff]  ;;  %v1605_v4 = vmov 0.0|0.0   ;;  %v593_v7 = vld [vmem:[%s483_s9 + $0x10] sm:$0xff]  ;;  %vm1606_vm1 = vmmov 0   ;;  %v1607_v10 = vmov 0.0  }
  0x3e   : > { %v506_v3 = vld [vmem:[%s1808_s21] sm:$0xff]  ;;  %1332 = vmatprep.subr.bf16.mxu1 %v1605_v4  ;;  %v1333_v5 = vpack.c.bf16 %v592_v2, %v591_v1  ;;  %1326 = vmatprep.subr.bf16.mxu0 %v1605_v4  ;;  %v507_v6 = vld [vmem:[%s1808_s21 + $0x8] sm:$0xff]  ;;  %v594_v8 = vld [vmem:[%s483_s9 + $0x18] sm:$0xff]  ;;  %vm517_vm2 = vcmask 261120   ;;  %vm753_vm3 = vcmask 64512   ;;  %p1245_p8 = scmp.ne.s32.totalorder %s1586_s19, 3 }
  0x3f   : > { %v1327_v9 = vpack.c.bf16 %v507_v6, %v506_v3  ;;  %1297 = vmatprep.mubr.msk.f32.mxu1 %vm1606_vm1, %v1607_v10  ;;  %v508_v11 = vld [vmem:[%s1808_s21 + $0x10] sm:$0xff]  ;;  %v509_v12 = vld [vmem:[%s1808_s21 + $0x18] sm:$0xff]  ;;  %1286 = vmatprep.mubr.msk.f32.mxu0 %vm1606_vm1, %v1607_v10  ;;  %v1336_v13 = vpack.c.bf16 %v594_v8, %v593_v7  ;;  %v505_v15 = vld [vmem:[%s1802_s16] sm:$0xff]  ;;  %s2046_s16 = scalar_lea.vmem %s1986_s2, %s1797_s24 }
  0x40   : > { %1334 = vmatpush3.bf16.msra.mxu1 %v1333_v5  ;;  %v1330_v14 = vpack.c.bf16 %v509_v12, %v508_v11  ;;  %v1237_v16 = vld [vmem:[%s486_s22] ss:$0 sm:$0xff]  ;;  %v673_v25 = vld [vmem:[%s1824_s0 + $0x8] sm:$0xff]  ;;  %v674_v26 = vld [vmem:[%s1824_s0 + $0x10] sm:$0xff] }
  0x41   : > { %1328 = vmatpush3.bf16.msra.mxu0 %v1327_v9  ;;  %1335 = vmatprep.subr.bf16.mxu1 %v1605_v4  ;;  %v1235_v17 = vld [vmem:[%s2046_s16] ss:$0 sm:$0xff]  ;;  %v675_v28 = vld [vmem:[%s1824_s0 + $0x18] sm:$0xff] }
  0x42   : > { %1329 = vmatprep.subr.bf16.mxu0 %v1605_v4  ;;  %v672_v24 = vld [vmem:[%s1824_s0] sm:$0xff]  ;;  %v1342_v29 = vpack.c.bf16 %v675_v28, %v674_v26 }
  0x43   : > { %v1339_v27 = vpack.c.bf16 %v673_v25, %v672_v24  ;;  %v1239_v39 = vld [vmem:[%s494_s1] ss:$0 sm:$0xff] }
  0x44   : > { %1337 = vmatpush3.bf16.msra.mxu1 %v1336_v13  ;;  %v916_v42 = vld [vmem:[%s1834_s13] sm:$0xff] }
  0x45   : > { %1331 = vmatpush3.bf16.msra.mxu0 %v1330_v14  ;;  %1311 = vmatprep.subr.mxu1 %v1607_v10  ;;  %v915_v48 = vld [vmem:[#allocation2] sm:$0xff] }
  0x46   : > { %1338 = vmatprep.subr.bf16.mxu0 %v1605_v4  ;;  %v1246_v53 = vld [vmem:[%s1992_s8] ss:$0 sm:$0xff] (!%p1245_p8) }
  0x47   : > { %1298 = vmatmul.mubr.msk.f32.vlgmr.msra.gmra.mrb[0].mxu1 %vm517_vm2, %v505_v15 }
  0x48   : > { %1287 = vmatmul.mubr.msk.f32.vlgmr.msra.gmra.mrb[0].mxu0 %vm517_vm2, %v505_v15  ;;  %1313 = vmatprep.mubr.msk.f32.mxu1 %vm1606_vm1, %v1607_v10 }
  0x49   : > { %1308 = vmatprep.mubr.msk.f32.mxu0 %vm1606_vm1, %v1607_v10  ;;  %1340 = vmatpush3.bf16.msra.mxu0 %v1339_v27 }
  0x4a   : > { %1341 = vmatprep.subr.bf16.mxu0 %v1605_v4 }
  0x4d   : > { %1343 = vmatpush3.bf16.msra.mxu0 %v1342_v29 }
  0x4e   : > { %1321 = vmatprep.subr.mxu0 %v1607_v10 }
  0x50   : > { %1309 = vmatmul.mubr.msk.f32.vlgmr.msra.gmra.mrb[2].mxu0 %vm517_vm2, %v505_v15 }
  0x51   : > { %1323 = vmatprep.mubr.msk.f32.mxu0 %vm1606_vm1, %v1607_v10  ;;  %1322 = vmatpush3.msra.mxu0 %v916_v42 }
 0x11a   : > { %v668_v18 = vpop.f32.mrb[0].mxu1 }
 0x11b   : > { %v669_v19 = vadd.f32 %v1237_v16, %v668_v18  ;;  %v1299_v20 = vpop.f32.mrb[1].mxu1  ;;  %v587_v21 = vpop.f32.mrb[0].mxu0 }
 0x11c   : > { %v588_v22 = vadd.f32 %v1235_v17, %v587_v21  ;;  %v1288_v23 = vpop.f32.mrb[1].mxu0 }
 0x11d   : > { %1312 = vmatpush3.xpose.msk.msra.mxu1 %vm753_vm3, %v669_v19 }
 0x11e   : > { %1316 = vmatprep.subr.mxu1 %v1607_v10 }
 0x120   : > { %1314 = vmatmul.mubr.msk.f32.vlgmr.msra.gmra.mrb[2].mxu1 %vm753_vm3, %v588_v22 }
 0x121   : > { %1318 = vmatprep.mubr.msk.f32.mxu1 %vm1606_vm1, %v1607_v10 }
 0x123   : > { %v749_v38 = vpop.f32.mrb[2].mxu0 }
 0x124   : > { %v1310_v40 = vpop.f32.mrb[3].mxu0  ;;  %v750_v41 = vadd.f32 %v1239_v39, %v749_v38 }
 0x126   : > { %1317 = vmatpush3.msra.mxu1 %v750_v41 }
 0x1f3   : > { %v826_v30 = vpop.f32.mrb[2].mxu1 }
 0x1f4   : > { %v1315_v31 = vpop.f32.mrb[3].mxu1  ;;  %v830_v32 = vsel %vm753_vm3, %v826_v30, -inf }
 0x1f5   : > { %831 = vmax.xlane.f32.xlu0 %v830_v32 }
 0x282   : > { %v832_v33 = vpop.xlane.xlu0 %831 }
 0x283   : > { %v833_v34 = vsub.f32 %v826_v30, %v832_v33 }
 0x285   : > { %v834_v35 = vmul.f32 1.442695, %v833_v34 }
 0x287   : > { %1448 = vpow2.f32 %v834_v35 }
 0x291   : > { %v1449_v36 = vpop.eup %1448 }
 0x292   : > { %v836_v37 = vsel %vm753_vm3, %v1449_v36, 0.0 }
 0x293   : > { %837 = vadd.xlane.f32.xlu0 %v836_v37 }
 0x320   : > { %v838_v43 = vpop.xlane.xlu0 %837 }
 0x321   : > { %1450 = vrcp.f32 %v838_v43 }
 0x32b   : > { %v1451_v44 = vpop.eup %1450 }
 0x32c   : > { %v840_v45 = vmul.f32 %v1451_v44, %v1449_v36 }
 0x32e   : > { %841 = vst.msk [vmem:[%s466_s23] sm:$0xff] %vm753_vm3, %v840_v45  ;;  %1319 = vmatmul.mubr.msk.f32.vlgmr.msra.gmra.mrb[4].mxu1 %vm753_vm3, %v840_v45 }
 0x401   : > { %v911_v46 = vpop.f32.mrb[4].mxu1 }
 0x402   : > { %v1320_v47 = vpop.f32.mrb[5].mxu1  ;;  %1324 = vmatmul.mubr.msk.f32.vlgmr.msra.gmra.mrb[4].mxu0 %vm753_vm3, %v911_v46 }
 0x4d2   : > { %995 = sbr.rel (%p1245_p8) target bundleno = 1251 (0x4e3), region = 64 }
 0x4d5   : > { %v986_v49 = vpop.f32.mrb[4].mxu0 }
 0x4d6   : > { %v990_v50 = vadd.f32 %v986_v49, %v915_v48  ;;  %v1325_v51 = vpop.f32.mrb[5].mxu0 }
 0x4d8   : > { %991 = vst.msk [vmem:[#allocation2] sm:$0xff] %vm517_vm2, %v990_v50 }
 0x4df   : > { %v996_v52 = vld [vmem:[#allocation2] sm:$0xff] }
 0x4e0   : > { %v1004_v54 = vadd.f32 %v1246_v53, %v996_v52 }
 0x4e2   : > { %1005 = vst.msk [vmem:[%s459_s10] sm:$0xff] %vm517_vm2, %v1004_v54 }
 0x4e3 PF: > { %s2047_s24 = sld [smem:[#allocation13_spill]]  ;;  %s1249_s22 = sshll.u32 %s1590_s20, 7 }
 0x4e4   : > { %s2049_s18 = sld [smem:[#allocation28_spill]]  ;;  %s1025_s30 = sshll.u32 %s459_s10, 4  ;;  %s1026_s30 = int_to_ptr.vmem [resolvable:$true] %s1025_s30 }
 0x4e5   : > { %s1452_s17 = scalar_lea.vmem %s1026_s30, 128  ;;  %s1608_s21 = smov [#allocation3]  }
 0x4e6   : > { %p1453_p9 = scmp.ne.s32.totalorder %s1026_s30, %s1452_s17  ;;  %s1456_s16 = sshll.u32 %s1608_s21, 4  ;;  %s1457_s16 = int_to_ptr.vmem [resolvable:$false] %s1456_s16 }
 0x4e7   : > { %s1458_s0 = scalar_lea.vmem %s1457_s16, 256  ;;  %p1459_p0 = scmp.lt.s32.totalorder %s1026_s30, %s1457_s16 }
 0x4e8   : > { %p1454_p10 = pnand %p1453_p9, %p1736_p3  ;;  %p1460_p1 = scmp.lt.s32.totalorder %s1458_s0, %s1452_s17 }
 0x4e9   : > { %s2051_s9 = sand.u32 1, %s2047_s24  }
 0x4ea   : > { %s2050_s26 = smov %s2049_s18  ;;  %s1894_s15 = scalar_lea.hbm %s2049_s18, %s1249_s22 }
 0x4eb   : > { %s1007_s14 = scalar_lea.sflag [#allocation4], %s2051_s9  ;;  %p1455_p11 = pneg %p1454_p10 }
 0x4ec   : > { %p1461_p4 = por %p1460_p1, %p1459_p0 }
 0x4ee   : > { %p1462_p2 = pnand %p1461_p4, %p1455_p11 }
 0x4f0   : > { %1465 = shalt.err (!%p1462_p2)
}
 0x4f1   : > { %s1466_s29 = scalar_lea.hbm %s1894_s15, 128  ;;  %s1470_s1 = scalar_lea.hbm %s2050_s26, 256 }
 0x4f2   : > { %p1467_p5 = scmp.ne.s32.totalorder %s1894_s15, %s1466_s29  ;;  %p1471_p9 = scmp.lt.u32.totalorder %s1894_s15, %s2050_s26 }
 0x4f3   : > { %p1472_p10 = scmp.lt.u32.totalorder %s1470_s1, %s1466_s29  ;;  %p1474_p0 = scmp.lt.u32.totalorder %s1466_s29, %s1894_s15 }
 0x4f4   : > { %p1468_p6 = pnand %p1467_p5, %p1736_p3 }
 0x4f5   : > { %p1473_p11 = por %p1472_p10, %p1471_p9 }
 0x4f6   : > { %p1469_p8 = pneg %p1468_p6 }
 0x4f7   : > { %p1475_p1 = por %p1474_p0, %p1473_p11 }
 0x4f9   : > { %p1476_p4 = pnand %p1475_p1, %p1469_p8 }
 0x4fb   : > { %1479 = shalt.err (!%p1476_p4)
}
 0x4fc   : > { %s2052_s22 = sld [smem:[#allocation10_spill]]  ;;  %s1250_s25 = sshll.u32 %s1590_s20, 2 }
 0x4fd   : > { %1344 = dma.vmem_to_hbm [thread:$0]  (%p1736_p3), %s1026_s30, 128, %s1894_s15, %s1007_s14  }
 0x4fe   : > { %s1040_s18 = sshll.u32 %s466_s23, 4  ;;  %s1036_s9 = sadd.s32 %s1586_s19, %s1250_s25  ;;  %s1921_s18 = int_to_ptr.vmem [resolvable:$true] %s1040_s18 }
 0x4ff   : > { %s1251_s17 = sshll.u32 %s1036_s9, 7  ;;  %s2054_s12 = sld [smem:[#allocation29_spill]] }
 0x500   : > { %s1480_s28 = scalar_lea.vmem %s1921_s18, 128  ;;  %s1609_s20 = smov [#allocation5]  }
 0x501   : > { %p1481_p2 = scmp.ne.s32.totalorder %s1921_s18, %s1480_s28  ;;  %s1484_s11 = sshll.u32 %s1609_s20, 4  ;;  %s1485_s11 = int_to_ptr.vmem [resolvable:$false] %s1484_s11 }
 0x502   : > { %s2055_s29 = sand.u32 1, %s2052_s22   ;;  %s1486_s19 = scalar_lea.vmem %s1485_s11, 256 }
 0x503   : > { %s1012_s10 = scalar_lea.sflag [#allocation6], %s2055_s29  ;;  %p1482_p3 = pnand %p1481_p2, %p1765_p12 }
 0x504   : > { %p1487_p6 = scmp.lt.s32.totalorder %s1921_s18, %s1485_s11  ;;  %p1488_p8 = scmp.lt.s32.totalorder %s1486_s19, %s1480_s28 }
 0x505   : > { %s1038_s0 = scalar_lea.hbm %s2054_s12, %s1251_s17  ;;  %p1483_p5 = pneg %p1482_p3 }
 0x506   : > { %p1489_p9 = por %p1488_p8, %p1487_p6 }
 0x508   : > { %p1490_p10 = pnand %p1489_p9, %p1483_p5 }
 0x50a   : > { %1493 = shalt.err (!%p1490_p10)
}
 0x50b   : > { %s1494_s23 = scalar_lea.hbm %s1038_s0, 128  ;;  %s1498_s14 = scalar_lea.hbm %s2054_s12, 1024 }
 0x50c   : > { %p1495_p11 = scmp.ne.s32.totalorder %s1038_s0, %s1494_s23  ;;  %p1499_p4 = scmp.lt.u32.totalorder %s1038_s0, %s2054_s12 }
 0x50d   : > { %p1500_p2 = scmp.lt.u32.totalorder %s1498_s14, %s1494_s23  ;;  %p1502_p13 = scmp.lt.u32.totalorder %s1494_s23, %s1038_s0 }
 0x50e   : > { %p1496_p0 = pnand %p1495_p11, %p1765_p12 }
 0x50f   : > { %p1501_p3 = por %p1500_p2, %p1499_p4 }
 0x510   : > { %p1497_p1 = pneg %p1496_p0 }
 0x511   : > { %p1503_p6 = por %p1502_p13, %p1501_p3 }
 0x513   : > { %p1504_p5 = pnand %p1503_p6, %p1497_p1 }
 0x515   : > { %1507 = shalt.err (!%p1504_p5)
}
 0x516   : > { %1345 = dma.vmem_to_hbm [thread:$0]  (%p1765_p12), %s1921_s18, 128, %s1038_s0, %s1012_s10  }
 0x517 PF: > { %s2056_s24 = sld [smem:[#allocation17_spill]]  ;;  %s2057_s22 = sld [smem:[#allocation12_spill]] }
 0x51d   : > { %p1355_p8 = scmp.ge.s32.totalorder %s2056_s24, 2  ;;  %s1052_s9 = sand.u32 1, %s2057_s22  }
 0x51e   : > { %s1053_s17 = scalar_lea.sflag [#allocation4], %s1052_s9 }
 0x51f   : > { %p1349_p9 = pnand %p1355_p8, %p1753_p7 }
 0x521   : > { %1553 = dma.done.wait (!%p1349_p9), %s1053_s17, 128  }
 0x522   : > { %1555 = vsyncadd (!%p1349_p9), %s1053_s17, 4294967168  ;;  %s2059_s21 = sld [smem:[#allocation9_spill]]  ;;  %s2060_s16 = sld [smem:[#allocation25_spill]] }
 0x528   : > { %s1061_s29 = sand.u32 1, %s2059_s21   ;;  %p2061_p13 = scmp.ne.s32.totalorder %s2060_s16, 0 }
 0x529   : > { %s1062_s28 = scalar_lea.sflag [#allocation6], %s1061_s29 }
 0x52a   : > { %p1352_p10 = pnand %p1355_p8, %p2061_p13 }
 0x52c   : > { %1557 = dma.done.wait (!%p1352_p10), %s1062_s28, 128  }
 0x52d   : > { %1559 = vsyncadd (!%p1352_p10), %s1062_s28, 4294967168  ;;  %s27_s23 = sadd.s32 1, %s2056_s24   ;;  %s2062_s13 = sld [smem:[#allocation10_spill]] }
 0x52e   : > { %p24_p12 = scmp.ge.s32.totalorder %s27_s23, 10   ;;  %s2063_s14 = sld [smem:[#allocation11_spill]] }
 0x52f   : > { %s2064_s15 = sld [smem:[#allocation24_spill]]  ;;  %s2065_s16 = sld [smem:[#allocation13_spill]] }
 0x530   : > { %s2066_s17 = sld [smem:[#allocation14_spill]]  ;;  %s2067_s18 = sld [smem:[#allocation23_spill]] }
 0x531   : > { %s2068_s19 = sld [smem:[#allocation15_spill]]  ;;  %s2069_s20 = sld [smem:[#allocation16_spill]] }
 0x532   : > { %s2070_s21 = sld [smem:[#allocation18_spill]]  ;;  %s2071_s22 = sld [smem:[#allocation20_spill]] }
 0x533   :  { %26 = sbr.rel (!%p24_p12) target bundleno = 14 (0xe), region = 137 }
 0x53a   :  { %1067 = vsyncpa [#allocation4], 1 }
 0x53b   :  { %1069 = vsyncpa [#allocation4 + $0x1], 1 }
 0x53c   :  { %1070 = vsyncpa [#allocation6], 1 }
 0x53d   :  { %1072 = vsyncpa [#allocation6 + $0x1], 1 }

</bundles_post_ra>
